<compile_context>
chip_gen: v5e
topology: v5e:2x2
jax: 0.10.0
libtpu: 0.0.40
codegen_flags: <defaults>
</compile_context>

<pallas_src>
import jax
import jax.numpy as jnp
from jax.experimental import pallas as pl
from jax.experimental.pallas import tpu as pltpu


def _round_up(x, m):
    return ((x + m - 1) // m) * m


def resblock_kernel(x_ref, wc_ref, bc_ref, w2_ref, b2_ref, o_ref):
    """One batch tile of the ResBlock forward.

    wc_ref = [W_skip | g1*W1]   (in_p, 2*out_p)  affine-1 folded, skip fused
    bc_ref = [0      | b1']     (1,    2*out_p)  f32
    w2_ref = g2*W2              (out_p, out_p)
    b2_ref = b2'                (1,    out_p)    f32
    """
    out_p = w2_ref.shape[0]

    # Cast activations to the weight dtype once (bf16 -> full-rate MXU on
    # v6e/v7x); all accumulation and VPU/EUP math stays f32 (v5e-safe).
    x = x_ref[...].astype(wc_ref.dtype)

    # Fused skip + branch-1 matmul: one MXU pass over x.
    h = jnp.dot(x, wc_ref[...], preferred_element_type=jnp.float32) + bc_ref[...]
    xskip = h[:, :out_p]                 # lane-aligned slice (out_p % 128 == 0)
    o1 = jnp.tanh(h[:, out_p:])

    # Branch 2 + residual add.
    h2 = jnp.dot(o1.astype(w2_ref.dtype), w2_ref[...],
                 preferred_element_type=jnp.float32) + b2_ref[...]
    o_ref[...] = (jnp.tanh(h2) + xskip).astype(o_ref.dtype)


def prepare_params(params, in_size, out_size, *, weight_dtype=jnp.float32):
    """One-time wrapper-side preprocessing (NOT per grid step):
    fold the Affine layers into the Linear weights/biases, zero-pad feature
    dims to multiples of 128 (lane-dense), fuse [W_skip | W1'] into a single
    matrix, and cast weights to `weight_dtype`."""
    in_p = _round_up(in_size, 128)
    out_p = _round_up(out_size, 128)

    g1, be1 = params["gain1"], params["bias1"]
    g2, be2 = params["gain2"], params["bias2"]
    w1, b1 = params["w1"], params["b1"]
    w2, b2 = params["w2"], params["b2"]

    # Affine fold: (x*g + be) @ W + b == x @ (g*W) + (b + be*sum(W, axis=0))
    w1f = g1 * w1
    b1f = b1 + be1 * jnp.sum(w1, axis=0, keepdims=True)
    w2f = g2 * w2
    b2f = b2 + be2 * jnp.sum(w2, axis=0, keepdims=True)

    w_skip = params.get("w_skip")
    if w_skip is None:
        # in_size == out_size -> nn.Identity skip; expressed as an identity
        # matrix inside the fused matmul (keeps the kernel uniform).
        assert in_size == out_size
        w_skip = jnp.eye(in_size, out_size, dtype=jnp.float32)

    w_skip_p = jnp.pad(w_skip, ((0, in_p - in_size), (0, out_p - out_size)))
    w1_p = jnp.pad(w1f, ((0, in_p - in_size), (0, out_p - out_size)))
    w2_p = jnp.pad(w2f, ((0, out_p - out_size), (0, out_p - out_size)))
    b1_p = jnp.pad(b1f, ((0, 0), (0, out_p - out_size)))
    b2_p = jnp.pad(b2f, ((0, 0), (0, out_p - out_size)))

    wc = jnp.concatenate([w_skip_p, w1_p], axis=1).astype(weight_dtype)
    bc = jnp.concatenate([jnp.zeros_like(b1_p), b1_p], axis=1).astype(jnp.float32)

    return {
        "wc": wc,                          # (in_p, 2*out_p)
        "bc": bc,                          # (1,    2*out_p)  f32
        "w2": w2_p.astype(weight_dtype),   # (out_p, out_p)
        "b2": b2_p.astype(jnp.float32),    # (1,    out_p)    f32
        "in_size": in_size, "out_size": out_size,
        "in_p": in_p, "out_p": out_p,
    }


def resblock_forward(x, prep, *, block_b=256):
    """x: (B, in_size) f32.  prep: output of prepare_params."""
    B = x.shape[0]
    in_size, out_size = prep["in_size"], prep["out_size"]
    in_p, out_p = prep["in_p"], prep["out_p"]

    # Batch tile: multiple of 8 sublanes, capped at block_b; pad B to a
    # multiple of the tile so the grid divides exactly.
    tb = min(block_b, _round_up(B, 8))
    b_p = _round_up(B, tb)
    x_p = jnp.pad(x.astype(jnp.float32), ((0, b_p - B), (0, in_p - in_size)))

    # VMEM budget: resident weights + double-buffered activation tiles +
    # live f32 intermediates (h/xskip/o1/h2), with slack.  Capped at 64 MiB so
    # the same sizing is legal on v7x (64 MiB physical VMEM per TC).
    wbytes = jnp.dtype(prep["wc"].dtype).itemsize
    weight_bytes = (in_p * 2 * out_p + out_p * out_p) * wbytes + 3 * out_p * 4
    act_bytes = 2 * tb * (in_p + out_p) * 4
    scratch_bytes = 4 * tb * out_p * 4
    vmem_limit = int(min(max(int(1.5 * (weight_bytes + act_bytes + scratch_bytes)),
                             16 * 1024 * 1024),
                         64 * 1024 * 1024))

    cost = pl.CostEstimate(
        flops=2 * b_p * (in_p * 2 * out_p + out_p * out_p),
        transcendentals=2 * b_p * out_p,
        bytes_accessed=weight_bytes + b_p * (in_p + out_p) * 4,
    )

    out = pl.pallas_call(
        resblock_kernel,
        out_shape=jax.ShapeDtypeStruct((b_p, out_p), jnp.float32),
        grid=(b_p // tb,),
        in_specs=[
            pl.BlockSpec((tb, in_p), lambda i: (i, 0)),         # x tile (pipelined)
            pl.BlockSpec((in_p, 2 * out_p), lambda i: (0, 0)),  # [W_skip|W1'] resident
            pl.BlockSpec((1, 2 * out_p), lambda i: (0, 0)),     # fused bias
            pl.BlockSpec((out_p, out_p), lambda i: (0, 0)),     # W2' resident
            pl.BlockSpec((1, out_p), lambda i: (0, 0)),         # b2'
        ],
        out_specs=pl.BlockSpec((tb, out_p), lambda i: (i, 0)),
        compiler_params=pltpu.CompilerParams(
            dimension_semantics=("parallel",),   # shard batch tiles across TCs
            vmem_limit_bytes=vmem_limit,
        ),
        cost_estimate=cost,
    )(x_p, prep["wc"], prep["bc"], prep["w2"], prep["b2"])

    return out[:B, :out_size]


def init_params(key, in_size, out_size):
    """Deterministic synthetic init (mimics nn.Linear uniform(-1/sqrt(fan_in)))."""
    ks = jax.random.split(key, 5)
    lim_in = 1.0 / jnp.sqrt(jnp.float32(in_size))
    lim_out = 1.0 / jnp.sqrt(jnp.float32(out_size))
    params = {
        # weights stored pre-transposed: (in_features, out_features)
        "w1": jax.random.uniform(ks[1], (in_size, out_size), jnp.float32, -lim_in, lim_in),
        "b1": jax.random.uniform(ks[2], (1, out_size), jnp.float32, -lim_in, lim_in),
        "w2": jax.random.uniform(ks[3], (out_size, out_size), jnp.float32, -lim_out, lim_out),
        "b2": jax.random.uniform(ks[4], (1, out_size), jnp.float32, -lim_out, lim_out),
        # Affine params are trainable in the PyTorch module; use non-trivial
        # values here so the wrapper-side fold is actually exercised.
        "gain1": jnp.float32(1.07),
        "bias1": jnp.float32(-0.03),
        "gain2": jnp.float32(0.93),
        "bias2": jnp.float32(0.05),
    }
    if in_size != out_size:
        params["w_skip"] = jax.random.uniform(
            ks[0], (in_size, out_size), jnp.float32, -lim_in, lim_in)
    else:
        params["w_skip"] = None            # nn.Identity skip
    return params


def resblock_ref(x, p):
    """Plain-JAX reference with the UN-folded math (matches the PyTorch module)."""
    xskip = x if p.get("w_skip") is None else x @ p["w_skip"]
    o1 = jnp.tanh((x * p["gain1"] + p["bias1"]) @ p["w1"] + p["b1"])
    o2 = jnp.tanh((o1 * p["gain2"] + p["bias2"]) @ p["w2"] + p["b2"]) + xskip
    return o2


if __name__ == "__main__":
    key = jax.random.PRNGKey(0)
    k_x, k_p, k_x2, k_p2 = jax.random.split(key, 4)

    # --- case 1: in_size != out_size (Linear skip) ---------------------------
    batch, in_size, out_size = 8, 32, 64
    x = jax.random.normal(k_x, (batch, in_size), jnp.float32)
    params = init_params(k_p, in_size, out_size)
    ref = resblock_ref(x, params)

    # f32 weights (exact path)
    prep_f32 = prepare_params(params, in_size, out_size, weight_dtype=jnp.float32)
    out_f32 = jax.block_until_ready(resblock_forward(x, prep_f32))
    assert out_f32.shape == (batch, out_size)
    assert jnp.allclose(out_f32, ref, atol=1e-4, rtol=1e-4)

    # bf16 weights/activations (full-rate MXU on v6e/v7x), f32 accumulation
    prep_bf16 = prepare_params(params, in_size, out_size, weight_dtype=jnp.bfloat16)
    out_bf16 = jax.block_until_ready(resblock_forward(x, prep_bf16))
    assert jnp.allclose(out_bf16, ref, atol=5e-2, rtol=5e-2)

    # --- case 2: in_size == out_size (Identity skip) -------------------------
    batch2, size2 = 16, 64
    x2 = jax.random.normal(k_x2, (batch2, size2), jnp.float32)
    params2 = init_params(k_p2, size2, size2)
    ref2 = resblock_ref(x2, params2)
    prep2 = prepare_params(params2, size2, size2, weight_dtype=jnp.float32)
    out2 = jax.block_until_ready(resblock_forward(x2, prep2))
    assert out2.shape == (batch2, size2)
    assert jnp.allclose(out2, ref2, atol=1e-4, rtol=1e-4)

    print("KERNEL_OK")
</pallas_src>

<mosaic_0001>
module attributes {stable_mosaic.version = 11 : i64} {
  func.func @resblock_kernel(%arg0: i32, %arg1: memref<8x128xf32, #tpu.memory_space<vmem>>, %arg2: memref<128x256xf32, #tpu.memory_space<vmem>>, %arg3: memref<1x256xf32, #tpu.memory_space<vmem>>, %arg4: memref<128x128xf32, #tpu.memory_space<vmem>>, %arg5: memref<1x128xf32, #tpu.memory_space<vmem>>, %arg6: memref<8x128xf32, #tpu.memory_space<vmem>>) attributes {dimension_semantics = [#tpu.dimension_semantics<parallel>], iteration_bounds = array<i64: 1>, scalar_prefetch = 0 : i64, scratch_operands = 0 : i64, tpu.core_type = #tpu.core_type<tc>, window_params = [{transform_indices = @transform_0, window_bounds = array<i64: 8, 128>}, {pipeline_mode = #tpu.pipeline_mode<synchronous>, transform_indices = @transform_1, window_bounds = array<i64: 128, 256>}, {pipeline_mode = #tpu.pipeline_mode<synchronous>, transform_indices = @transform_2, window_bounds = array<i64: 1, 256>}, {pipeline_mode = #tpu.pipeline_mode<synchronous>, transform_indices = @transform_3, window_bounds = array<i64: 128, 128>}, {pipeline_mode = #tpu.pipeline_mode<synchronous>, transform_indices = @transform_4, window_bounds = array<i64: 1, 128>}, {transform_indices = @transform_5, window_bounds = array<i64: 8, 128>}]} {
    %c0 = arith.constant 0 : index
    %c0_0 = arith.constant 0 : index
    %0 = vector.load %arg1[%c0, %c0_0] : memref<8x128xf32, #tpu.memory_space<vmem>>, vector<8x128xf32>
    %c0_1 = arith.constant 0 : index
    %c0_2 = arith.constant 0 : index
    %1 = vector.load %arg2[%c0_1, %c0_2] : memref<128x256xf32, #tpu.memory_space<vmem>>, vector<128x256xf32>
    %cst = arith.constant dense<0.000000e+00> : vector<8x256xf32>
    %2 = tpu.matmul %0, %1, %cst {dimension_numbers = #tpu.dot_dimension_numbers<[1], [0], [0], [1], [0, 0, 1, 1], [], []>} : vector<8x128xf32>, vector<128x256xf32>, vector<8x256xf32> -> vector<8x256xf32>
    %c0_3 = arith.constant 0 : index
    %c0_4 = arith.constant 0 : index
    %3 = vector.load %arg3[%c0_3, %c0_4] : memref<1x256xf32, #tpu.memory_space<vmem>>, vector<1x256xf32>
    %4 = vector.broadcast %3 : vector<1x256xf32> to vector<8x256xf32>
    %5 = arith.addf %2, %4 : vector<8x256xf32>
    %6 = vector.extract_strided_slice %5 {offsets = [0, 0], sizes = [8, 128], strides = [1, 1]} : vector<8x256xf32> to vector<8x128xf32>
    %7 = vector.extract_strided_slice %5 {offsets = [0, 128], sizes = [8, 128], strides = [1, 1]} : vector<8x256xf32> to vector<8x128xf32>
    %8 = math.tanh %7 : vector<8x128xf32>
    %c0_5 = arith.constant 0 : index
    %c0_6 = arith.constant 0 : index
    %9 = vector.load %arg4[%c0_5, %c0_6] : memref<128x128xf32, #tpu.memory_space<vmem>>, vector<128x128xf32>
    %cst_7 = arith.constant dense<0.000000e+00> : vector<8x128xf32>
    %10 = tpu.matmul %8, %9, %cst_7 {dimension_numbers = #tpu.dot_dimension_numbers<[1], [0], [0], [1], [0, 0, 1, 1], [], []>} : vector<8x128xf32>, vector<128x128xf32>, vector<8x128xf32> -> vector<8x128xf32>
    %c0_8 = arith.constant 0 : index
    %c0_9 = arith.constant 0 : index
    %11 = vector.load %arg5[%c0_8, %c0_9] : memref<1x128xf32, #tpu.memory_space<vmem>>, vector<1x128xf32>
    %12 = vector.broadcast %11 : vector<1x128xf32> to vector<8x128xf32>
    %13 = arith.addf %10, %12 : vector<8x128xf32>
    %14 = math.tanh %13 : vector<8x128xf32>
    %15 = arith.addf %14, %6 : vector<8x128xf32>
    %c0_10 = arith.constant 0 : index
    %c0_11 = arith.constant 0 : index
    %16 = vector.load %arg6[%c0_10, %c0_11] : memref<8x128xf32, #tpu.memory_space<vmem>>, vector<8x128xf32>
    tpu.vector_store %arg6[%c0_10, %c0_11], %15 {strides = array<i32>} : memref<8x128xf32, #tpu.memory_space<vmem>>, vector<8x128xf32>,
    return
  }
  func.func @transform_0(%arg0: i32) -> (i32, i32) {
    %c0_i32 = arith.constant 0 : i32
    %c0_i32_0 = arith.constant 0 : i32
    return %arg0, %c0_i32 : i32, i32
  }
  func.func @transform_1(%arg0: i32) -> (i32, i32) {
    %c0_i32 = arith.constant 0 : i32
    %c0_i32_0 = arith.constant 0 : i32
    %c0_i32_1 = arith.constant 0 : i32
    return %c0_i32, %c0_i32_0 : i32, i32
  }
  func.func @transform_2(%arg0: i32) -> (i32, i32) {
    %c0_i32 = arith.constant 0 : i32
    %c0_i32_0 = arith.constant 0 : i32
    %c0_i32_1 = arith.constant 0 : i32
    return %c0_i32, %c0_i32_0 : i32, i32
  }
  func.func @transform_3(%arg0: i32) -> (i32, i32) {
    %c0_i32 = arith.constant 0 : i32
    %c0_i32_0 = arith.constant 0 : i32
    %c0_i32_1 = arith.constant 0 : i32
    return %c0_i32, %c0_i32_0 : i32, i32
  }
  func.func @transform_4(%arg0: i32) -> (i32, i32) {
    %c0_i32 = arith.constant 0 : i32
    %c0_i32_0 = arith.constant 0 : i32
    %c0_i32_1 = arith.constant 0 : i32
    return %c0_i32, %c0_i32_0 : i32, i32
  }
  func.func @transform_5(%arg0: i32) -> (i32, i32) {
    %c0_i32 = arith.constant 0 : i32
    %c0_i32_0 = arith.constant 0 : i32
    return %arg0, %c0_i32 : i32, i32
  }
}

</mosaic_0001>

<bundles_post_ra>
// kernel: tpu_custom_call.1
= control target key start
LH: loop header
LB: loop body
LE: loop exit
PB: predicated region body
PF: predicated region fallthrough
CT: control target
= control target key end

     0   :  { %10 = vsyncpa [#allocation3], 0  ;;  %s421_s0 = inlined_call_operand.hbm [shape: f32[8,128], index: 0, kind: input, shape index: {}]   ;;  %s422_s1 = inlined_call_operand.hbm [shape: f32[128,256], index: 1, kind: input, shape index: {}]   ;;  %s423_s2 = inlined_call_operand.hbm [shape: f32[1,256], index: 2, kind: input, shape index: {}]   ;;  %s424_s3 = inlined_call_operand.hbm [shape: f32[128,128], index: 3, kind: input, shape index: {}]   ;;  %s425_s4 = inlined_call_operand.vmem [shape: f32[1,128], index: 4, kind: input, shape index: {}]   ;;  %s426_s5 = inlined_call_operand.hbm [shape: f32[8,128], index: 5, kind: output, shape index: {}]  }
   0x1   :  { %11 = vsyncpa [#allocation6], 0 }
   0x2   :  { %12 = vsyncpa [#allocation9], 0  ;;  %s29_s20 = sshll.u32 %s422_s1, 4  ;;  %s30_s20 = int_to_ptr.hbm [resolvable:$true] %s29_s20 }
   0x3   :  { %13 = vsyncpa [#allocation4], 0  ;;  %s364_s21 = smov [#allocation5]   ;;  %s19_s25 = sshll.u32 %s421_s0, 4  ;;  %s20_s25 = int_to_ptr.hbm [resolvable:$true] %s19_s25 }
   0x4   :  { %s31_s22 = sshll.u32 %s364_s21, 4  ;;  %s365_s26 = smov 256   ;;  %s32_s22 = int_to_ptr.vmem [resolvable:$true] %s31_s22 }
   0x5   :  { %s366_s27 = smov 16   ;;  %s367_s28 = smov [#allocation2]  }
   0x6   :  { %37 = dma.hbm_to_vmem [thread:$0]  %s30_s20, 4096, %s32_s22, [#allocation6], %s365_s26, %s365_s26, %s366_s27  }
   0x7   :  { %s21_s29 = sshll.u32 %s367_s28, 4  ;;  %s43_s7 = sshll.u32 %s423_s2, 4  ;;  %s22_s29 = int_to_ptr.vmem [resolvable:$true] %s21_s29  ;;  %s44_s7 = int_to_ptr.hbm [resolvable:$true] %s43_s7 }
   0x8   :  { %24 = dma.hbm_to_vmem [thread:$0]  %s20_s25, 128, %s22_s29, [#allocation3]  }
   0x9   :  { %s53_s9 = sshll.u32 %s424_s3, 4  ;;  %s368_s10 = smov [#allocation7]   ;;  %s54_s9 = int_to_ptr.hbm [resolvable:$true] %s53_s9 }
   0xa   :  { %s45_s11 = sshll.u32 %s368_s10, 4  ;;  %s369_s0 = smov [#allocation8]   ;;  %s46_s11 = int_to_ptr.vmem [resolvable:$true] %s45_s11 }
   0xb   :  { %48 = dma.hbm_to_vmem [thread:$0]  %s44_s7, 32, %s46_s11, [#allocation6]  }
   0xc   :  { %s55_s12 = sshll.u32 %s369_s0, 4  ;;  %s370_s13 = smov 128   ;;  %s56_s12 = int_to_ptr.vmem [resolvable:$true] %s55_s12 }
   0xd   :  { %s371_s14 = smov 8  }
   0xe   :  { %61 = dma.hbm_to_vmem [thread:$0]  %s54_s9, 2048, %s56_s12, [#allocation9], %s370_s13, %s370_s13, %s371_s14  }
   0xf   :  { %356 = dma.done.wait [#allocation3], 128  }
  0x10   :  { %357 = vsyncadd [#allocation3], 4294967168 }
  0x11   :  { %358 = dma.done.wait [#allocation6], 4128  }
  0x12   :  { %359 = vsyncadd [#allocation6], 4294963168 }
  0x13   :  { %360 = dma.done.wait [#allocation9], 2048  }
  0x14   :  { %361 = vsyncadd [#allocation9], 4294965248  ;;  %v112_v0 = vld [vmem:[#allocation5 + $0xf8] sm:$0xff]  ;;  %v110_v1 = vld [vmem:[#allocation5 + $0xe8] sm:$0xff]  ;;  %s372_s15 = smov [#allocation10]   ;;  %s210_s19 = sshll.u32 %s426_s5, 4  ;;  %s211_s19 = int_to_ptr.hbm [resolvable:$true] %s210_s19 }
  0x15   :  { %139 = vmatpush.msra.mxu1 %v112_v0  ;;  %v108_v2 = vld [vmem:[#allocation5 + $0xd8] sm:$0xff]  ;;  %v106_v3 = vld [vmem:[#allocation5 + $0xc8] sm:$0xff]  ;;  %v111_v9 = vld [vmem:[#allocation5 + $0xf0] sm:$0xff]  ;;  %s208_s16 = sshll.u32 %s372_s15, 4  ;;  %s209_s16 = int_to_ptr.vmem [resolvable:$true] %s208_s16 }
  0x16   :  { %v175_v4 = vld [vmem:[#allocation8 + $0x78] sm:$0xff]  ;;  %v174_v6 = vld [vmem:[#allocation8 + $0x70] sm:$0xff]  ;;  %v173_v7 = vld [vmem:[#allocation8 + $0x68] sm:$0xff]  ;;  %119 = vmatpush.msra.mxu0 %v111_v9 }
  0x17   :  { %140 = vmatpush.msra.mxu1 %v110_v1  ;;  %v104_v5 = vld [vmem:[#allocation5 + $0xb8] sm:$0xff]  ;;  %180 = vmatpush.msra.mxu2 %v175_v4  ;;  %v102_v8 = vld [vmem:[#allocation5 + $0xa8] sm:$0xff]  ;;  %v109_v10 = vld [vmem:[#allocation5 + $0xe0] sm:$0xff] }
  0x18   :  { %v172_v11 = vld [vmem:[#allocation8 + $0x60] sm:$0xff]  ;;  %v100_v12 = vld [vmem:[#allocation5 + $0x98] sm:$0xff]  ;;  %v107_v13 = vld [vmem:[#allocation5 + $0xd0] sm:$0xff]  ;;  %120 = vmatpush.msra.mxu0 %v109_v10 }
  0x19   :  { %141 = vmatpush.msra.mxu1 %v108_v2  ;;  %181 = vmatpush.msra.mxu2 %v174_v6  ;;  %v171_v14 = vld [vmem:[#allocation8 + $0x58] sm:$0xff]  ;;  %v98_v15 = vld [vmem:[#allocation5 + $0x88] sm:$0xff]  ;;  %v170_v17 = vld [vmem:[#allocation8 + $0x50] sm:$0xff] }
  0x1a   :  { %v105_v16 = vld [vmem:[#allocation5 + $0xc0] sm:$0xff]  ;;  %121 = vmatpush.msra.mxu0 %v107_v13  ;;  %v96_v18 = vld [vmem:[#allocation5 + $0x78] sm:$0xff]  ;;  %v103_v19 = vld [vmem:[#allocation5 + $0xb0] sm:$0xff] }
  0x1b   :  { %142 = vmatpush.msra.mxu1 %v106_v3  ;;  %182 = vmatpush.msra.mxu2 %v173_v7  ;;  %v169_v20 = vld [vmem:[#allocation8 + $0x48] sm:$0xff]  ;;  %v168_v22 = vld [vmem:[#allocation8 + $0x40] sm:$0xff]  ;;  %v92_v23 = vld [vmem:[#allocation5 + $0x58] sm:$0xff] }
  0x1c   :  { %122 = vmatpush.msra.mxu0 %v105_v16  ;;  %v94_v21 = vld [vmem:[#allocation5 + $0x68] sm:$0xff]  ;;  %v167_v24 = vld [vmem:[#allocation8 + $0x38] sm:$0xff]  ;;  %v166_v26 = vld [vmem:[#allocation8 + $0x30] sm:$0xff] }
  0x1d   :  { %143 = vmatpush.msra.mxu1 %v104_v5  ;;  %183 = vmatpush.msra.mxu2 %v172_v11  ;;  %v90_v25 = vld [vmem:[#allocation5 + $0x48] sm:$0xff]  ;;  %v88_v27 = vld [vmem:[#allocation5 + $0x38] sm:$0xff]  ;;  %v101_v34 = vld [vmem:[#allocation5 + $0xa0] sm:$0xff] }
  0x1e   :  { %123 = vmatpush.msra.mxu0 %v103_v19  ;;  %v165_v28 = vld [vmem:[#allocation8 + $0x28] sm:$0xff]  ;;  %v84_v30 = vld [vmem:[#allocation5 + $0x18] sm:$0xff]  ;;  %v164_v33 = vld [vmem:[#allocation8 + $0x20] sm:$0xff] }
  0x1f   :  { %144 = vmatpush.msra.mxu1 %v102_v8  ;;  %184 = vmatpush.msra.mxu2 %v171_v14  ;;  %v86_v29 = vld [vmem:[#allocation5 + $0x28] sm:$0xff]  ;;  %v80_v32 = vld [vmem:[#allocation2] sm:$0xff]  ;;  %v99_v36 = vld [vmem:[#allocation5 + $0x90] sm:$0xff] }
  0x20   :  { %v82_v31 = vld [vmem:[#allocation5 + $0x8] sm:$0xff]  ;;  %124 = vmatpush.msra.mxu0 %v101_v34  ;;  %v163_v35 = vld [vmem:[#allocation8 + $0x18] sm:$0xff]  ;;  %v162_v37 = vld [vmem:[#allocation8 + $0x10] sm:$0xff] }
  0x21   :  { %145 = vmatpush.msra.mxu1 %v100_v12  ;;  %185 = vmatpush.msra.mxu2 %v170_v17  ;;  %v97_v38 = vld [vmem:[#allocation5 + $0x80] sm:$0xff]  ;;  %v161_v39 = vld [vmem:[#allocation8 + $0x8] sm:$0xff]  ;;  %v231_v54 = vld [vmem:[%s425_s4] ss:$0 sm:$0xff] }
  0x22   :  { %125 = vmatpush.msra.mxu0 %v99_v36  ;;  %v95_v40 = vld [vmem:[#allocation5 + $0x70] sm:$0xff]  ;;  %v160_v41 = vld [vmem:[#allocation8] sm:$0xff]  ;;  %v113_v49 = vld [vmem:[#allocation7] sm:$0x3] }
  0x23   :  { %146 = vmatpush.msra.mxu1 %v98_v15  ;;  %186 = vmatpush.msra.mxu2 %v169_v20  ;;  %v93_v42 = vld [vmem:[#allocation5 + $0x60] sm:$0xff]  ;;  %v91_v43 = vld [vmem:[#allocation5 + $0x50] sm:$0xff]  ;;  %v116_v50 = vperm.slane %v113_v49, 1  ;;  %v115_v57 = vperm.slane %v113_v49, 0 }
  0x24   :  { %126 = vmatpush.msra.mxu0 %v97_v38  ;;  %v89_v44 = vld [vmem:[#allocation5 + $0x40] sm:$0xff]  ;;  %v87_v45 = vld [vmem:[#allocation5 + $0x30] sm:$0xff] }
  0x25   :  { %147 = vmatpush.msra.mxu1 %v96_v18  ;;  %187 = vmatpush.msra.mxu2 %v168_v22  ;;  %v85_v46 = vld [vmem:[#allocation5 + $0x20] sm:$0xff]  ;;  %v83_v47 = vld [vmem:[#allocation5 + $0x10] sm:$0xff] }
  0x26   :  { %127 = vmatpush.msra.mxu0 %v95_v40  ;;  %v81_v48 = vld [vmem:[#allocation5] sm:$0xff] }
  0x27   :  { %148 = vmatpush.msra.mxu1 %v94_v21  ;;  %188 = vmatpush.msra.mxu2 %v167_v24 }
  0x28   :  { %128 = vmatpush.msra.mxu0 %v93_v42 }
  0x29   :  { %149 = vmatpush.msra.mxu1 %v92_v23  ;;  %189 = vmatpush.msra.mxu2 %v166_v26 }
  0x2a   :  { %129 = vmatpush.msra.mxu0 %v91_v43 }
  0x2b   :  { %150 = vmatpush.msra.mxu1 %v90_v25  ;;  %190 = vmatpush.msra.mxu2 %v165_v28 }
  0x2c   :  { %130 = vmatpush.msra.mxu0 %v89_v44 }
  0x2d   :  { %151 = vmatpush.msra.mxu1 %v88_v27  ;;  %191 = vmatpush.msra.mxu2 %v164_v33 }
  0x2e   :  { %131 = vmatpush.msra.mxu0 %v87_v45 }
  0x2f   :  { %152 = vmatpush.msra.mxu1 %v86_v29  ;;  %192 = vmatpush.msra.mxu2 %v163_v35 }
  0x30   :  { %132 = vmatpush.msra.mxu0 %v85_v46 }
  0x31   :  { %153 = vmatpush.msra.mxu1 %v84_v30  ;;  %193 = vmatpush.msra.mxu2 %v162_v37 }
  0x32   :  { %133 = vmatpush.msra.mxu0 %v83_v47 }
  0x33   :  { %154 = vmatpush.msra.mxu1 %v82_v31  ;;  %194 = vmatpush.msra.mxu2 %v161_v39 }
  0x34   :  { %155 = vmatmul.f32.vlgmr.msra.gmra.mxu1 %v80_v32  ;;  %134 = vmatpush.msra.mxu0 %v81_v48 }
  0x35   :  { %195 = vmatpush.msra.mxu2 %v160_v41  ;;  %135 = vmatmul.f32.vlgmr.msra.gmra.mxu0 %v80_v32 }
  0xb1   :  { %v156_v51 = vpop.f32.mrf.mxu1 }
  0xb2   :  { %v157_v52 = vadd.f32 %v156_v51, %v116_v50  ;;  %v136_v58 = vpop.f32.mrf.mxu0 }
  0xb3   :  { %v137_v59 = vadd.f32 %v136_v58, %v115_v57 }
  0xb4   :  { %232 = vtanh.f32 %v157_v52 }
  0xba   :  { %v233_v53 = vpop.eup %232 }
  0xbb   :  { %196 = vmatmul.f32.vlgmr.msra.gmra.mxu2 %v233_v53 }
 0x13e   :  { %v197_v55 = vpop.f32.mrf.mxu2 }
 0x13f   :  { %v198_v56 = vadd.f32 %v231_v54, %v197_v55 }
 0x141   :  { %234 = vtanh.f32 %v198_v56 }
 0x147   :  { %v235_v60 = vpop.eup %234 }
 0x148   :  { %v201_v61 = vadd.f32 %v235_v60, %v137_v59 }
 0x14a   :  { %202 = vst [vmem:[#allocation10] sm:$0xff] %v201_v61 }
 0x14b   :  { %213 = dma.vmem_to_hbm [thread:$0]  %s209_s16, 128, %s211_s19, [#allocation4]  }
 0x14c   :  { %362 = dma.done.wait [#allocation4], 128  }
 0x14d   :  { %363 = vsyncadd [#allocation4], 4294967168 }
 0x14e   :  { %218 = vsyncpa [#allocation3], 1 }
 0x14f   :  { %219 = vsyncpa [#allocation6], 1 }
 0x150   :  { %220 = vsyncpa [#allocation9], 1 }
 0x151   :  { %221 = vsyncpa [#allocation4], 1 }

</bundles_post_ra>
